<compile_context>
chip_gen: v7x
topology: tpu7x:2x2x1
jax: 0.10.0
libtpu: 0.0.40
codegen_flags: <defaults>
</compile_context>

<pallas_src>
import jax
import jax.numpy as jnp
from jax.experimental import pallas as pl
from jax.experimental.pallas import tpu as pltpu


_MAX_TILE_B = 8  # batch rows per block are unrolled in the kernel; keep modest


def _graph_unpool_kernel(x_ref, w_ref, b_ref, o_ref):
    # x_ref : (tile_b, in_nodes, tile_f)   native-layout activation slab
    # w_ref : (out_nodes, in_nodes)        full weight, resident every step
    # b_ref : (out_nodes, 1)               f32 bias column, broadcast over feat
    # o_ref : (tile_b, out_nodes, tile_f)
    w = w_ref[...]
    bias = b_ref[...]
    # Static unroll over the batch rows of this block: each row is one MXU
    # matmul (out_nodes, in_nodes) @ (in_nodes, tile_f) with f32 accumulation,
    # followed by an f32 VPU epilogue (bias add + cast).  Equivalent to
    # einsum('oi,bif->bof') but avoids any in-kernel transpose/relayout.
    for bi in range(x_ref.shape[0]):
        y = jnp.dot(w, x_ref[bi], preferred_element_type=jnp.float32)
        o_ref[bi] = (y + bias).astype(o_ref.dtype)


def _hw_params():
    """Per-generation VMEM budget / grid policy (with conservative fallback)."""
    kind = ""
    try:
        kind = jax.devices()[0].device_kind.lower()
    except Exception:
        pass
    if "7" in kind:
        # v7x: 64 MiB physical VMEM per TensorCore, 2 TensorCores per chip.
        return dict(vmem_limit_bytes=48 << 20, block_budget=28 << 20,
                    prefer_multi_step=True)
    if "v5" in kind or "v6" in kind:
        # v5e / v6e: single TensorCore, 128 MiB physical VMEM.  Raise the
        # scoped-VMEM limit well above the 16/32 MiB default (headroom kept).
        return dict(vmem_limit_bytes=96 << 20, block_budget=64 << 20,
                    prefer_multi_step=False)
    # Unknown chip: keep the compiler-default VMEM limit, stay conservative.
    return dict(vmem_limit_bytes=None, block_budget=16 << 20,
                prefer_multi_step=False)


def _divisors(n):
    return [d for d in range(1, n + 1) if n % d == 0]


def _pick_tiles(B, in_nodes, out_nodes, feat, x_itemsize, out_itemsize,
                w_itemsize, block_budget, prefer_multi_step):
    """Largest legal (tile_b, tile_f) whose double-buffered blocks fit budget.

    tile_f must be a multiple of 128 (lane-dense, unmasked DMA / vst) or the
    full feature dim; tile_b is any divisor of B up to the unroll cap.
    """
    if feat % 128 == 0:
        tf_cands = sorted((d for d in _divisors(feat) if d % 128 == 0),
                          reverse=True)
    else:
        tf_cands = [feat]  # block == full dim satisfies the (8,128) rule
    tb_cands = sorted((d for d in _divisors(B) if d <= _MAX_TILE_B),
                      reverse=True)

    # Resident (constant-index_map) weight/bias: default double-buffered copy
    # pair is charged here so streamed tiles never overflow VMEM.
    fixed = 2 * out_nodes * in_nodes * w_itemsize + 2 * out_nodes * 4

    def block_bytes(tb, tf):
        return (fixed
                + 2 * tb * in_nodes * tf * x_itemsize      # x tile, 2 buffers
                + 2 * tb * out_nodes * tf * out_itemsize)  # out tile, 2 buffers

    tile_b, tile_f = tb_cands[-1], tf_cands[-1]   # minimal legal fallback
    found = False
    for tf in tf_cands:            # prefer the widest (lane-dense) feat tile,
        for tb in tb_cands:        # then the most batch rows per step
            if block_bytes(tb, tf) <= block_budget:
                tile_b, tile_f = tb, tf
                found = True
                break
        if found:
            break

    # v7x has two TensorCores: ensure >= 2 grid steps so "parallel" can shard.
    if prefer_multi_step and (B // tile_b) * (feat // tile_f) < 2:
        if B >= 2 and B % 2 == 0:
            tile_b = B // 2
        elif len(tf_cands) > 1:
            tile_f = tf_cands[1]
    return tile_b, tile_f


def graph_unpool(x, weight, bias):
    """x: (B, in_nodes, feat); weight: (out_nodes, in_nodes); bias: (out_nodes,).

    Returns (B, out_nodes, feat), matching
        nn.Linear(in_nodes, out_nodes)(X.transpose(1, 2)).transpose(1, 2).
    """
    B, in_nodes, feat = x.shape
    out_nodes, in_nodes_w = weight.shape
    assert in_nodes_w == in_nodes, "weight shape mismatch"

    # Tiny resident column; broadcast over the lane (feat) axis in-kernel.
    bias_col = bias.reshape(out_nodes, 1).astype(jnp.float32)

    hw = _hw_params()
    x_item = jnp.dtype(x.dtype).itemsize
    w_item = jnp.dtype(weight.dtype).itemsize
    out_item = x_item
    tile_b, tile_f = _pick_tiles(B, in_nodes, out_nodes, feat,
                                 x_item, out_item, w_item,
                                 hw["block_budget"], hw["prefer_multi_step"])
    grid = (B // tile_b, feat // tile_f)

    # True HBM traffic: each operand read once, output written once — no
    # hidden transpose copies anymore.
    cost = pl.CostEstimate(
        flops=2 * B * out_nodes * in_nodes * feat,
        transcendentals=0,
        bytes_accessed=(B * in_nodes * feat * x_item
                        + out_nodes * in_nodes * w_item
                        + out_nodes * 4
                        + B * out_nodes * feat * out_item),
    )

    y = pl.pallas_call(
        _graph_unpool_kernel,
        out_shape=jax.ShapeDtypeStruct((B, out_nodes, feat), x.dtype),
        grid_spec=pltpu.PrefetchScalarGridSpec(
            num_scalar_prefetch=0,
            grid=grid,
            in_specs=[
                # Native-layout activation slab; feat is the lane axis.
                pl.BlockSpec((tile_b, in_nodes, tile_f), lambda b, j: (b, 0, j)),
                # Weight / bias: constant index_map -> fetched once, reused.
                pl.BlockSpec((out_nodes, in_nodes), lambda b, j: (0, 0)),
                pl.BlockSpec((out_nodes, 1), lambda b, j: (0, 0)),
            ],
            out_specs=pl.BlockSpec((tile_b, out_nodes, tile_f),
                                   lambda b, j: (b, 0, j)),
        ),
        compiler_params=pltpu.CompilerParams(
            # Independent (batch, feat) tiles -> shardable across TensorCores.
            dimension_semantics=("parallel", "parallel"),
            vmem_limit_bytes=hw["vmem_limit_bytes"],
        ),
        cost_estimate=cost,
    )(x, weight, bias_col)
    return y


def _reference(x, weight, bias):
    # out[b, o, f] = sum_i W[o, i] * x[b, i, f] + bias[o]
    return jnp.einsum("oi,bif->bof", weight, x) + bias[None, :, None]


if __name__ == "__main__":
    key = jax.random.PRNGKey(0)
    kx, kw, kb = jax.random.split(key, 3)

    B = 2
    in_nodes = 8      # coarse graph nodes
    out_nodes = 16    # unpooled node count
    feat = 64         # feature dim

    x = jax.random.normal(kx, (B, in_nodes, feat), dtype=jnp.float32)

    # Deterministic nn.Linear-style init: U(-1/sqrt(in_nodes), 1/sqrt(in_nodes))
    bound = 1.0 / jnp.sqrt(jnp.float32(in_nodes))
    weight = jax.random.uniform(kw, (out_nodes, in_nodes),
                                minval=-bound, maxval=bound, dtype=jnp.float32)
    bias = jax.random.uniform(kb, (out_nodes,),
                              minval=-bound, maxval=bound, dtype=jnp.float32)

    out = graph_unpool(x, weight, bias)
    out = jax.block_until_ready(out)

    ref = _reference(x, weight, bias)
    assert out.shape == (B, out_nodes, feat)
    assert jnp.allclose(out, ref, atol=1e-5, rtol=1e-5), "mismatch vs reference"

    print("KERNEL_OK")
</pallas_src>

<mosaic_0001>
module attributes {stable_mosaic.version = 11 : i64} {
  func.func @_graph_unpool_kernel(%arg0: i32, %arg1: i32, %arg2: memref<2x8x64xf32, #tpu.memory_space<vmem>>, %arg3: memref<16x8xf32, #tpu.memory_space<vmem>>, %arg4: memref<16x1xf32, #tpu.memory_space<vmem>>, %arg5: memref<2x16x64xf32, #tpu.memory_space<vmem>>) attributes {dimension_semantics = [#tpu.dimension_semantics<parallel>, #tpu.dimension_semantics<parallel>], iteration_bounds = array<i64: 1, 1>, scalar_prefetch = 0 : i64, scratch_operands = 0 : i64, tpu.core_type = #tpu.core_type<tc>, window_params = [{transform_indices = @transform_0, window_bounds = array<i64: 2, 8, 64>}, {pipeline_mode = #tpu.pipeline_mode<synchronous>, transform_indices = @transform_1, window_bounds = array<i64: 16, 8>}, {pipeline_mode = #tpu.pipeline_mode<synchronous>, transform_indices = @transform_2, window_bounds = array<i64: 16, 1>}, {transform_indices = @transform_3, window_bounds = array<i64: 2, 16, 64>}]} {
    %c0 = arith.constant 0 : index
    %c0_0 = arith.constant 0 : index
    %0 = vector.load %arg3[%c0, %c0_0] : memref<16x8xf32, #tpu.memory_space<vmem>>, vector<16x8xf32>
    %c0_1 = arith.constant 0 : index
    %c0_2 = arith.constant 0 : index
    %1 = vector.load %arg4[%c0_1, %c0_2] : memref<16x1xf32, #tpu.memory_space<vmem>>, vector<16x1xf32>
    %c0_3 = arith.constant 0 : index
    %c0_4 = arith.constant 0 : index
    %c0_5 = arith.constant 0 : index
    %2 = vector.load %arg2[%c0_3, %c0_4, %c0_5] : memref<2x8x64xf32, #tpu.memory_space<vmem>>, vector<1x8x64xf32>
    %3 = vector.shape_cast %2 : vector<1x8x64xf32> to vector<8x64xf32>
    %cst = arith.constant dense<0.000000e+00> : vector<16x64xf32>
    %4 = tpu.matmul %0, %3, %cst {dimension_numbers = #tpu.dot_dimension_numbers<[1], [0], [0], [1], [0, 0, 1, 1], [], []>} : vector<16x8xf32>, vector<8x64xf32>, vector<16x64xf32> -> vector<16x64xf32>
    %5 = vector.broadcast %1 : vector<16x1xf32> to vector<16x64xf32>
    %6 = arith.addf %4, %5 : vector<16x64xf32>
    %c0_6 = arith.constant 0 : index
    %c0_7 = arith.constant 0 : index
    %c0_8 = arith.constant 0 : index
    %7 = vector.load %arg5[%c0_6, %c0_7, %c0_8] : memref<2x16x64xf32, #tpu.memory_space<vmem>>, vector<1x16x64xf32>
    %8 = vector.shape_cast %7 : vector<1x16x64xf32> to vector<16x64xf32>
    %9 = vector.shape_cast %6 : vector<16x64xf32> to vector<1x16x64xf32>
    tpu.vector_store %arg5[%c0_6, %c0_7, %c0_8], %9 {strides = array<i32>} : memref<2x16x64xf32, #tpu.memory_space<vmem>>, vector<1x16x64xf32>,
    %c1 = arith.constant 1 : index
    %c0_9 = arith.constant 0 : index
    %c0_10 = arith.constant 0 : index
    %10 = vector.load %arg2[%c1, %c0_9, %c0_10] : memref<2x8x64xf32, #tpu.memory_space<vmem>>, vector<1x8x64xf32>
    %11 = vector.shape_cast %10 : vector<1x8x64xf32> to vector<8x64xf32>
    %cst_11 = arith.constant dense<0.000000e+00> : vector<16x64xf32>
    %12 = tpu.matmul %0, %11, %cst_11 {dimension_numbers = #tpu.dot_dimension_numbers<[1], [0], [0], [1], [0, 0, 1, 1], [], []>} : vector<16x8xf32>, vector<8x64xf32>, vector<16x64xf32> -> vector<16x64xf32>
    %13 = vector.broadcast %1 : vector<16x1xf32> to vector<16x64xf32>
    %14 = arith.addf %12, %13 : vector<16x64xf32>
    %c1_12 = arith.constant 1 : index
    %c0_13 = arith.constant 0 : index
    %c0_14 = arith.constant 0 : index
    %15 = vector.load %arg5[%c1_12, %c0_13, %c0_14] : memref<2x16x64xf32, #tpu.memory_space<vmem>>, vector<1x16x64xf32>
    %16 = vector.shape_cast %15 : vector<1x16x64xf32> to vector<16x64xf32>
    %17 = vector.shape_cast %14 : vector<16x64xf32> to vector<1x16x64xf32>
    tpu.vector_store %arg5[%c1_12, %c0_13, %c0_14], %17 {strides = array<i32>} : memref<2x16x64xf32, #tpu.memory_space<vmem>>, vector<1x16x64xf32>,
    return
  }
  func.func @transform_0(%arg0: i32, %arg1: i32) -> (i32, i32, i32) {
    %c0_i32 = arith.constant 0 : i32
    %c0_i32_0 = arith.constant 0 : i32
    return %arg0, %c0_i32, %arg1 : i32, i32, i32
  }
  func.func @transform_1(%arg0: i32, %arg1: i32) -> (i32, i32) {
    %c0_i32 = arith.constant 0 : i32
    %c0_i32_0 = arith.constant 0 : i32
    %c0_i32_1 = arith.constant 0 : i32
    return %c0_i32, %c0_i32_0 : i32, i32
  }
  func.func @transform_2(%arg0: i32, %arg1: i32) -> (i32, i32) {
    %c0_i32 = arith.constant 0 : i32
    %c0_i32_0 = arith.constant 0 : i32
    %c0_i32_1 = arith.constant 0 : i32
    return %c0_i32, %c0_i32_0 : i32, i32
  }
  func.func @transform_3(%arg0: i32, %arg1: i32) -> (i32, i32, i32) {
    %c0_i32 = arith.constant 0 : i32
    %c0_i32_0 = arith.constant 0 : i32
    return %arg0, %c0_i32, %arg1 : i32, i32, i32
  }
}

</mosaic_0001>

<bundles_post_ra>
// kernel: tpu_custom_call.1
= control target key start
LH: loop header
LB: loop body
LE: loop exit
PB: predicated region body
PF: predicated region fallthrough
CT: control target
= control target key end

     0   :  { %vm30_vm0 = vcmask 64512   ;;  %s315_s0 = inlined_call_operand.vmem [shape: f32[2,8,64], index: 0, kind: input, shape index: {}]   ;;  %s316_s1 = inlined_call_operand.vmem [shape: f32[16,8], index: 1, kind: input, shape index: {}]   ;;  %s317_s2 = inlined_call_operand.vmem [shape: f32[16,1], index: 2, kind: input, shape index: {}]   ;;  %s318_s3 = inlined_call_operand.hbm [shape: f32[2,16,64], index: 3, kind: output, shape index: {}]  }
   0x1   :  { %v19_v0 = vld [vmem:[%s315_s0] sm:$0xff]  ;;  %v213_v1 = vld [vmem:[%s315_s0 + $0x8] sm:$0xff] }
   0x2   :  { %v15_v2 = vld [vmem:[%s316_s1] sm:$0xff]  ;;  %222 = vmatprep.subr.mxu0 %v19_v0  ;;  %227 = vmatprep.subr.mxu1 %v213_v1  ;;  %v16_v3 = vld [vmem:[%s316_s1 + $0x8] sm:$0xff] }
   0x3   :  { %223 = vmatpush3.msra.mxu0 %v19_v0  ;;  %224 = vmatprep.mubr.msk.f32.mxu0 %vm30_vm0, %v15_v2 }
   0x4   :  { %8 = vsyncpa [#allocation3], 0  ;;  %228 = vmatpush3.msra.mxu1 %v213_v1  ;;  %229 = vmatprep.mubr.msk.f32.mxu1 %vm30_vm0, %v15_v2  ;;  %v17_v4 = vld [vmem:[%s317_s2] sm:$0xff]  ;;  %v261_v5 = vmov 0   ;;  %v18_v6 = vld [vmem:[%s317_s2 + $0x8] sm:$0xff]  ;;  %s262_s1 = smov [#allocation2]  }
   0x5   :  { %225 = vmatmul.mubr.msk.f32.vlgmr.msra.gmra.mrb[0].mxu0 %vm30_vm0, %v16_v3  ;;  %230 = vmatmul.mubr.msk.f32.vlgmr.msra.gmra.mrb[0].mxu1 %vm30_vm0, %v16_v3  ;;  %s200_s23 = sshll.u32 %s262_s1, 4  ;;  %vm112_vm1 = vcmask 523264   ;;  %s201_s23 = int_to_ptr.vmem [resolvable:$true] %s200_s23 }
   0x6   :  { %236 = vset.pattern.permute.xlu0 %v261_v5  ;;  %s237_s2 = scalar_lea.vmem %s201_s23, 512  ;;  %p242_p1 = scmp.lt.s32.totalorder %s201_s23, %s201_s23 }
   0x7   :  { %22 = vperm.xlu0 %236, %v17_v4   ;;  %p238_p0 = scmp.ne.s32.totalorder %s201_s23, %s237_s2  ;;  %p243_p2 = scmp.lt.s32.totalorder %s237_s2, %s237_s2 }
   0x9   :  { %p244_p3 = por %p243_p2, %p242_p1 }
   0xb   :  { %27 = vperm.xlu0 %236, %v18_v6   ;;  %p245_p4 = pnand %p244_p3, %p238_p0 }
  0x86   :  { %v23_v7 = vpop.permute.xlu0 %22 }
  0x8a   :  { %v28_v8 = vpop.permute.xlu0 %27 }
  0xd8   :  { %v226_v9 = vpop.f32.mrb[0].mxu0  ;;  %v231_v10 = vpop.f32.mrb[0].mxu1 }
  0xd9   :  { %v109_v11 = vadd.f32 %v226_v9, %v28_v8  ;;  %v189_v12 = vadd.f32 %v231_v10, %v28_v8  ;;  %v103_v13 = vpop.f32.mrb[1].mxu0  ;;  %v183_v14 = vpop.f32.mrb[1].mxu1 }
  0xda   :  { %v104_v15 = vadd.f32 %v103_v13, %v23_v7  ;;  %v184_v16 = vadd.f32 %v183_v14, %v23_v7 }
  0xdb   :  { %114 = vst.msk [vmem:[#allocation2 + $0x8] sm:$0xff] %vm112_vm1, %v109_v11  ;;  %194 = vst.msk [vmem:[#allocation2 + $0x18] sm:$0xff] %vm112_vm1, %v189_v12 }
  0xdc   :  { %113 = vst.msk [vmem:[#allocation2] sm:$0xff] %vm112_vm1, %v104_v15  ;;  %193 = vst.msk [vmem:[#allocation2 + $0x10] sm:$0xff] %vm112_vm1, %v184_v16 }
  0xdd   :  { %248 = shalt.err (!%p245_p4)
}
  0xde   :  { %s249_s26 = scalar_lea.hbm %s318_s3, 512 }
  0xdf   :  { %p250_p5 = scmp.ne.s32.totalorder %s318_s3, %s249_s26  ;;  %p253_p6 = scmp.lt.u32.totalorder %s249_s26, %s318_s3 }
  0xe1   :  { %p255_p7 = pnand %p253_p6, %p250_p5 }
  0xe3   :  { %258 = shalt.err (!%p255_p7)
}
  0xe4   :  { %s263_s4 = smov 128   ;;  %s264_s5 = smov 8  }
  0xe5   :  { %206 = dma.vmem_to_hbm [thread:$0]  %s201_s23, 512, %s318_s3, [#allocation3], %s263_s4, %s263_s4, %s264_s5  }
  0xe6   :  { %259 = dma.done.wait [#allocation3], 512  }
  0xe7   :  { %260 = vsyncadd [#allocation3], 4294966784 }
  0xe8   :  { %210 = vsyncpa [#allocation3], 1 }

</bundles_post_ra>
